<compile_context>
chip_gen: v7x
topology: tpu7x:2x2x1
jax: 0.10.0
libtpu: 0.0.40
codegen_flags: <defaults>
</compile_context>

<pallas_src>
import jax
import jax.numpy as jnp
from jax.experimental import pallas as pl
from jax.experimental.pallas import tpu as pltpu

NUM_MAPS = 8  # hard-coded inside ClassWisePoolFunction2.forward


def _cdiv(a, b):
    return -(-a // b)


def _round_up(a, m):
    return _cdiv(a, m) * m


def _classwise_pool_kernel(x_ref, o_ref):
    # x_ref : (T, NUM_MAPS, HW) block -- T channel groups, 8 maps each, lane-dense spatial
    # o_ref : (T, HW) block
    # Single cross-sublane reduction over the 8 maps; f32 accumulate, scale, store.
    # Pure filler underneath the DMAs -- this kernel is HBM-bandwidth bound.
    s = jnp.sum(x_ref[...].astype(jnp.float32), axis=1)
    o_ref[...] = (s * (1.0 / NUM_MAPS)).astype(o_ref.dtype)


def _tpu_vmem_capacity_bytes():
    try:
        cap = getattr(pltpu.get_tpu_info(), "vmem_capacity_bytes", None)
        if cap:
            return int(cap)
    except Exception:
        pass
    return 64 << 20  # conservative (v7x-sized VMEM); safe on every generation


def _choose_rows_per_step(n_rows, row_bytes, target_block_bytes, packing,
                          min_block_bytes=2 << 20):
    """Rows (channel groups) per grid step -- the leading block dim."""
    if n_rows <= packing:
        return n_rows  # one block equal to the full leading dim (always legal)
    max_t = (n_rows // packing) * packing
    total_bytes = n_rows * row_bytes
    # Enough steps to keep each input block near the per-generation byte target.
    steps = max(1, _cdiv(total_bytes, target_block_bytes))
    # Prefer an even step count >= 2 (both v7x TCs stream HBM, balanced) as long
    # as blocks stay >= ~2 MiB and >= `packing` rows; never shrink below that.
    steps_cap = max(1, min(total_bytes // min_block_bytes, n_rows // packing))
    steps = min(max(steps, 2 if steps_cap >= 2 else 1), steps_cap)
    if steps % 2 and steps > 1:
        steps = steps + 1 if steps + 1 <= steps_cap else steps - 1
    t = min(max_t, _round_up(_cdiv(n_rows, steps), packing))
    # One nudge toward an even grid count (harmless on single-TC chips).
    g = _cdiv(n_rows, t)
    if g > 1 and g % 2:
        for cand in (t + packing, t - packing):
            if packing <= cand <= max_t and _cdiv(n_rows, cand) % 2 == 0:
                t = cand
                break
    return t


@jax.jit
def classwise_pool2(x):
    """x: (B, C, H, W) with C % 8 == 0. Returns (B, C//8, H, W), mean over map groups."""
    B, C, H, W = x.shape
    assert C % NUM_MAPS == 0, "channels must be a multiple of num_maps (8)"
    num_outputs = C // NUM_MAPS

    N = B * num_outputs
    HW = H * W

    # (B, C, H, W) -> (B*num_outputs, NUM_MAPS, H*W): contiguous, metadata-only under jit.
    x2 = x.reshape(N, NUM_MAPS, HW)

    itemsize = jnp.dtype(x.dtype).itemsize
    packing = 8 * max(1, 4 // itemsize)  # sublane packing: 8 f32 / 16 bf16 / 32 int8
    row_bytes = NUM_MAPS * HW * itemsize

    # Per-generation block target / VMEM cap (v7x has only 64 MiB VMEM per TC).
    vmem_cap = _tpu_vmem_capacity_bytes()
    if vmem_cap <= (64 << 20):
        target_block_bytes, vmem_cap_limit = 8 << 20, 48 << 20    # v7x-like
    else:
        target_block_bytes, vmem_cap_limit = 12 << 20, 96 << 20   # v5e / v6e (128 MiB)

    t = _choose_rows_per_step(N, row_bytes, target_block_bytes, packing)
    grid = (_cdiv(N, t),)  # uneven last block is masked by the pipeline

    in_block_bytes = t * NUM_MAPS * HW * itemsize
    out_block_bytes = t * HW * itemsize
    f32_tmp_bytes = t * (NUM_MAPS + 1) * HW * 4  # reduce may materialize f32 copies
    vmem_limit = int(min(
        vmem_cap_limit,
        max(32 << 20, 2 * (in_block_bytes + out_block_bytes) + f32_tmp_bytes + (4 << 20))))

    out = pl.pallas_call(
        _classwise_pool_kernel,
        out_shape=jax.ShapeDtypeStruct((N, HW), x.dtype),
        grid=grid,
        # Trailing block dims equal the full array dims (NUM_MAPS, HW): contiguous
        # HBM DMAs and no padding, even when H*W % 128 != 0.
        in_specs=[pl.BlockSpec((t, NUM_MAPS, HW), lambda i: (i, 0, 0))],
        out_specs=pl.BlockSpec((t, HW), lambda i: (i, 0)),
        compiler_params=pltpu.CompilerParams(
            dimension_semantics=("parallel",),
            vmem_limit_bytes=vmem_limit,
        ),
    )(x2)

    return out.reshape(B, num_outputs, H, W)


# Note: for integer input dtypes the mean is accumulated in f32 and cast back on
# store (not a true integer mean); the module is intended for float feature maps.
# TODO(synk): backward pass (gradient broadcast over the 8 maps) is not implemented;
# only the forward semantics of ClassWisePool2 are provided.


if __name__ == "__main__":
    key = jax.random.PRNGKey(0)

    # batch=2, num_classes=4, num_maps=8 -> channels=32, spatial 16x16
    B, num_classes, H, W = 2, 4, 16, 16
    C = num_classes * NUM_MAPS
    x = jax.random.normal(key, (B, C, H, W), dtype=jnp.float32)

    out = jax.block_until_ready(classwise_pool2(x))
    ref = jnp.sum(x.reshape(B, num_classes, NUM_MAPS, H, W), axis=2) / NUM_MAPS
    assert out.shape == (B, num_classes, H, W)
    assert jnp.allclose(out, ref, atol=1e-5, rtol=1e-5)

    # Non-multiple-of-128 spatial size (14x14) exercises the unpadded block path.
    B2, nc2, H2, W2 = 2, 3, 14, 14
    x2 = jax.random.normal(jax.random.PRNGKey(0),
                           (B2, nc2 * NUM_MAPS, H2, W2), dtype=jnp.float32)
    out2 = jax.block_until_ready(classwise_pool2(x2))
    ref2 = jnp.sum(x2.reshape(B2, nc2, NUM_MAPS, H2, W2), axis=2) / NUM_MAPS
    assert out2.shape == (B2, nc2, H2, W2)
    assert jnp.allclose(out2, ref2, atol=1e-5, rtol=1e-5)

    print("KERNEL_OK")
</pallas_src>

<mosaic_0001>
module attributes {stable_mosaic.version = 11 : i64} {
  func.func @_classwise_pool_kernel(%arg0: i32, %arg1: memref<8x8x256xf32, #tpu.memory_space<vmem>>, %arg2: memref<8x256xf32, #tpu.memory_space<vmem>>) attributes {dimension_semantics = [#tpu.dimension_semantics<parallel>], iteration_bounds = array<i64: 1>, scalar_prefetch = 0 : i64, scratch_operands = 0 : i64, tpu.core_type = #tpu.core_type<tc>, window_params = [{transform_indices = @transform_0, window_bounds = array<i64: 8, 8, 256>}, {transform_indices = @transform_1, window_bounds = array<i64: 8, 256>}]} {
    %c0 = arith.constant 0 : index
    %c0_0 = arith.constant 0 : index
    %c0_1 = arith.constant 0 : index
    %0 = vector.load %arg1[%c0, %c0_0, %c0_1] : memref<8x8x256xf32, #tpu.memory_space<vmem>>, vector<8x8x256xf32>
    %cst = arith.constant dense<0.000000e+00> : vector<8x256xf32>
    %1 = vector.multi_reduction <add>, %0, %cst [1] : vector<8x8x256xf32> to vector<8x256xf32>
    %cst_2 = arith.constant 1.250000e-01 : f32
    %2 = vector.broadcast %cst_2 : f32 to vector<8x256xf32>
    %3 = arith.mulf %1, %2 : vector<8x256xf32>
    %c0_3 = arith.constant 0 : index
    %c0_4 = arith.constant 0 : index
    %4 = vector.load %arg2[%c0_3, %c0_4] : memref<8x256xf32, #tpu.memory_space<vmem>>, vector<8x256xf32>
    tpu.vector_store %arg2[%c0_3, %c0_4], %3 {strides = array<i32>} : memref<8x256xf32, #tpu.memory_space<vmem>>, vector<8x256xf32>,
    return
  }
  func.func @transform_0(%arg0: i32) -> (i32, i32, i32) {
    %c0_i32 = arith.constant 0 : i32
    %c0_i32_0 = arith.constant 0 : i32
    %c0_i32_1 = arith.constant 0 : i32
    return %arg0, %c0_i32, %c0_i32_0 : i32, i32, i32
  }
  func.func @transform_1(%arg0: i32) -> (i32, i32) {
    %c0_i32 = arith.constant 0 : i32
    %c0_i32_0 = arith.constant 0 : i32
    return %arg0, %c0_i32 : i32, i32
  }
}

</mosaic_0001>

<bundles_post_ra>
// kernel: classwise_pool2.1
= control target key start
LH: loop header
LB: loop body
LE: loop exit
PB: predicated region body
PF: predicated region fallthrough
CT: control target
= control target key end

     0   :  { %vm152_vm0 = vcmask 1041409   ;;  %vm154_vm1 = vcmask 1042434   ;;  %vm156_vm2 = vcmask 1043459   ;;  %vm158_vm3 = vcmask 1044484   ;;  %s261_s0 = inlined_call_operand.vmem [shape: f32[8,8,256], index: 0, kind: input, shape index: {}]   ;;  %s262_s1 = inlined_call_operand.vmem [shape: f32[8,256], index: 1, kind: output, shape index: {}]  }
   0x1   :  { %v8_v0 = vld [vmem:[%s261_s0] sm:$0xff]  ;;  %v9_v1 = vld [vmem:[%s261_s0 + $0x8] sm:$0xff]  ;;  %v10_v2 = vld [vmem:[%s261_s0 + $0x10] sm:$0xff]  ;;  %vm160_vm4 = vcmask 1045509   ;;  %vm162_vm5 = vcmask 1046534   ;;  %vm164_vm6 = vcmask 1047559  }
   0x2   :  { %v11_v3 = vld [vmem:[%s261_s0 + $0x18] sm:$0xff]  ;;  %v12_v4 = vld [vmem:[%s261_s0 + $0x20] sm:$0xff]  ;;  %v13_v5 = vld [vmem:[%s261_s0 + $0x28] sm:$0xff]  ;;  %v24_v6 = vrot.slane %v8_v0, 4  ;;  %v30_v7 = vrot.slane %v9_v1, 4  ;;  %v36_v8 = vrot.slane %v10_v2, 4 }
   0x3   :  { %v14_v9 = vld [vmem:[%s261_s0 + $0x30] sm:$0xff]  ;;  %v15_v10 = vld [vmem:[%s261_s0 + $0x38] sm:$0xff]  ;;  %v42_v11 = vrot.slane %v11_v3, 4  ;;  %v48_v12 = vrot.slane %v12_v4, 4  ;;  %v54_v13 = vrot.slane %v13_v5, 4  ;;  %v16_v42 = vld [vmem:[%s261_s0 + $0x40] sm:$0xff] }
   0x4   :  { %v25_v14 = vadd.f32 %v24_v6, %v8_v0  ;;  %v31_v15 = vadd.f32 %v30_v7, %v9_v1  ;;  %v37_v16 = vadd.f32 %v36_v8, %v10_v2  ;;  %v60_v17 = vrot.slane %v14_v9, 4  ;;  %v17_v43 = vld [vmem:[%s261_s0 + $0x48] sm:$0xff]  ;;  %v18_v44 = vld [vmem:[%s261_s0 + $0x50] sm:$0xff]  ;;  %v19_v49 = vld [vmem:[%s261_s0 + $0x58] sm:$0xff] }
   0x5   :  { %v43_v18 = vadd.f32 %v42_v11, %v11_v3  ;;  %v49_v19 = vadd.f32 %v48_v12, %v12_v4  ;;  %v55_v20 = vadd.f32 %v54_v13, %v13_v5  ;;  %v66_v21 = vrot.slane %v15_v10, 4  ;;  %v20_v50 = vld [vmem:[%s261_s0 + $0x60] sm:$0xff]  ;;  %v21_v51 = vld [vmem:[%s261_s0 + $0x68] sm:$0xff]  ;;  %v22_v54 = vld [vmem:[%s261_s0 + $0x70] sm:$0xff] }
   0x6   :  { %v26_v22 = vrot.slane %v25_v14, 2  ;;  %v32_v23 = vrot.slane %v31_v15, 2  ;;  %v38_v24 = vrot.slane %v37_v16, 2  ;;  %v61_v25 = vadd.f32 %v60_v17, %v14_v9  ;;  %v23_v59 = vld [vmem:[%s261_s0 + $0x78] sm:$0xff] }
   0x7   :  { %v44_v26 = vrot.slane %v43_v18, 2  ;;  %v50_v27 = vrot.slane %v49_v19, 2  ;;  %v56_v28 = vrot.slane %v55_v20, 2  ;;  %v67_v29 = vadd.f32 %v66_v21, %v15_v10 }
   0x8   :  { %v27_v30 = vadd.f32 %v26_v22, %v25_v14  ;;  %v33_v31 = vadd.f32 %v32_v23, %v31_v15  ;;  %v39_v32 = vadd.f32 %v38_v24, %v37_v16  ;;  %v62_v33 = vrot.slane %v61_v25, 2 }
   0x9   :  { %v45_v34 = vadd.f32 %v44_v26, %v43_v18  ;;  %v51_v35 = vadd.f32 %v50_v27, %v49_v19  ;;  %v57_v36 = vadd.f32 %v56_v28, %v55_v20  ;;  %v68_v37 = vrot.slane %v67_v29, 2 }
   0xa   :  { %v28_v38 = vrot.slane %v27_v30, 1  ;;  %v34_v39 = vrot.slane %v33_v31, 1  ;;  %v40_v40 = vrot.slane %v39_v32, 1  ;;  %v215_v41 = vadd.f32 %v62_v33, %v61_v25 }
   0xb   :  { %v46_v45 = vrot.slane %v45_v34, 1  ;;  %v52_v46 = vrot.slane %v51_v35, 1  ;;  %v58_v47 = vrot.slane %v57_v36, 1  ;;  %v69_v48 = vadd.f32 %v68_v37, %v67_v29 }
   0xc   :  { %v29_v52 = vadd.f32 %v28_v38, %v27_v30  ;;  %v35_v53 = vadd.f32 %v34_v39, %v33_v31  ;;  %v41_v55 = vadd.f32 %v40_v40, %v39_v32  ;;  %v64_v58 = vrot.slane %v215_v41, 1 }
   0xd   :  { %v47_v56 = vadd.f32 %v46_v45, %v45_v34  ;;  %v53_v57 = vadd.f32 %v52_v46, %v51_v35  ;;  %v59_v60 = vadd.f32 %v58_v47, %v57_v36  ;;  %v72_v61 = vrot.slane %v16_v42, 4 }
   0xe   :  { %v78_v62 = vrot.slane %v17_v43, 4  ;;  %v84_v63 = vrot.slane %v18_v44, 4  ;;  %v70_v0 = vrot.slane %v69_v48, 1  ;;  %v90_v1 = vrot.slane %v19_v49, 4 }
   0xf   :  { %v96_v2 = vrot.slane %v20_v50, 4  ;;  %v102_v3 = vrot.slane %v21_v51, 4  ;;  %v73_v4 = vadd.f32 %v72_v61, %v16_v42  ;;  %v108_v7 = vrot.slane %v22_v54, 4 }
  0x10   :  { %v79_v5 = vadd.f32 %v78_v62, %v17_v43  ;;  %v85_v6 = vadd.f32 %v84_v63, %v18_v44  ;;  %v91_v8 = vadd.f32 %v90_v1, %v19_v49  ;;  %v114_v11 = vrot.slane %v23_v59, 4 }
  0x11   :  { %v97_v9 = vadd.f32 %v96_v2, %v20_v50  ;;  %v103_v10 = vadd.f32 %v102_v3, %v21_v51  ;;  %v74_v12 = vrot.slane %v73_v4, 2  ;;  %v109_v15 = vadd.f32 %v108_v7, %v22_v54 }
  0x12   :  { %v80_v13 = vrot.slane %v79_v5, 2  ;;  %v86_v14 = vrot.slane %v85_v6, 2  ;;  %v92_v16 = vrot.slane %v91_v8, 2  ;;  %v115_v19 = vadd.f32 %v114_v11, %v23_v59 }
  0x13   :  { %v98_v17 = vrot.slane %v97_v9, 2  ;;  %v104_v18 = vrot.slane %v103_v10, 2  ;;  %v75_v20 = vadd.f32 %v74_v12, %v73_v4  ;;  %v110_v23 = vrot.slane %v109_v15, 2 }
  0x14   :  { %v81_v21 = vadd.f32 %v80_v13, %v79_v5  ;;  %v87_v22 = vadd.f32 %v86_v14, %v85_v6  ;;  %v93_v24 = vadd.f32 %v92_v16, %v91_v8  ;;  %v116_v27 = vrot.slane %v115_v19, 2 }
  0x15   :  { %v99_v25 = vadd.f32 %v98_v17, %v97_v9  ;;  %v105_v26 = vadd.f32 %v104_v18, %v103_v10  ;;  %v76_v28 = vrot.slane %v75_v20, 1  ;;  %v111_v31 = vadd.f32 %v110_v23, %v109_v15 }
  0x16   :  { %v82_v29 = vrot.slane %v81_v21, 1  ;;  %v88_v30 = vrot.slane %v87_v22, 1  ;;  %v94_v32 = vrot.slane %v93_v24, 1  ;;  %v117_v35 = vadd.f32 %v116_v27, %v115_v19 }
  0x17   :  { %v100_v33 = vrot.slane %v99_v25, 1  ;;  %v106_v34 = vrot.slane %v105_v26, 1  ;;  %v65_v36 = vadd.f32 %v64_v58, %v215_v41  ;;  %v71_v37 = vadd.f32 %v70_v0, %v69_v48 }
  0x18   :  { %v77_v38 = vadd.f32 %v76_v28, %v75_v20  ;;  %v112_v39 = vrot.slane %v111_v31, 1  ;;  %v83_v40 = vadd.f32 %v82_v29, %v81_v21  ;;  %v89_v42 = vadd.f32 %v88_v30, %v87_v22 }
  0x19   :  { %v95_v43 = vadd.f32 %v94_v32, %v93_v24  ;;  %v118_v44 = vrot.slane %v117_v35, 1  ;;  %v101_v45 = vadd.f32 %v100_v33, %v99_v25  ;;  %v120_v46 = vmul.f32 0.125, %v29_v52 }
  0x1a   :  { %v121_v47 = vmul.f32 0.125, %v35_v53  ;;  %v122_v49 = vmul.f32 0.125, %v41_v55  ;;  %v107_v50 = vadd.f32 %v106_v34, %v105_v26  ;;  %v123_v51 = vmul.f32 0.125, %v47_v56 }
  0x1b   :  { %v124_v54 = vmul.f32 0.125, %v53_v57  ;;  %v125_v59 = vmul.f32 0.125, %v59_v60  ;;  %v113_v61 = vadd.f32 %v112_v39, %v111_v31  ;;  %v119_v62 = vadd.f32 %v118_v44, %v117_v35 }
  0x1c   :  { %v126_v63 = vmul.f32 0.125, %v65_v36  ;;  %v127_v1 = vmul.f32 0.125, %v71_v37  ;;  %v128_v41 = vmul.f32 0.125, %v77_v38  ;;  %v129_v48 = vmul.f32 0.125, %v83_v40 }
  0x1d   :  { %v130_v58 = vmul.f32 0.125, %v89_v42  ;;  %v131_v0 = vmul.f32 0.125, %v95_v43  ;;  %v153_v2 = vsel %vm152_vm0, %v122_v49, %v120_v46  ;;  %v166_v52 = vsel %vm152_vm0, %v123_v51, %v121_v47 }
  0x1e   :  { %v132_v53 = vmul.f32 0.125, %v101_v45  ;;  %v133_v55 = vmul.f32 0.125, %v107_v50  ;;  %v155_v56 = vsel %vm154_vm1, %v124_v54, %v153_v2  ;;  %v167_v57 = vsel %vm154_vm1, %v125_v59, %v166_v52 }
  0x1f   :  { %v134_v60 = vmul.f32 0.125, %v113_v61  ;;  %v135_v3 = vmul.f32 0.125, %v119_v62  ;;  %v157_v4 = vsel %vm156_vm2, %v126_v63, %v155_v56  ;;  %v168_v5 = vsel %vm156_vm2, %v127_v1, %v167_v57 }
  0x20   :  { %v159_v6 = vsel %vm158_vm3, %v128_v41, %v157_v4  ;;  %v169_v7 = vsel %vm158_vm3, %v129_v48, %v168_v5 }
  0x21   :  { %v161_v8 = vsel %vm160_vm4, %v130_v58, %v159_v6  ;;  %v170_v9 = vsel %vm160_vm4, %v131_v0, %v169_v7 }
  0x22   :  { %v163_v10 = vsel %vm162_vm5, %v132_v53, %v161_v8  ;;  %v171_v11 = vsel %vm162_vm5, %v133_v55, %v170_v9 }
  0x23   :  { %v165_v12 = vsel %vm164_vm6, %v134_v60, %v163_v10  ;;  %v172_v13 = vsel %vm164_vm6, %v135_v3, %v171_v11 }
  0x24   :  { %175 = vst [vmem:[%s262_s1] sm:$0xff] %v165_v12  ;;  %176 = vst [vmem:[%s262_s1 + $0x8] sm:$0xff] %v172_v13 }

</bundles_post_ra>
